<compile_context>
chip_gen: v7x
topology: tpu7x:2x2x1
jax: 0.10.0
libtpu: 0.0.40
codegen_flags: <defaults>
</compile_context>

<pallas_src>
import numpy as np
import jax
import jax.numpy as jnp
from jax.experimental import pallas as pl
from jax.experimental.pallas import tpu as pltpu


def _drop_path_kernel(scale_ref, x_ref, o_ref):
    # scale_ref: (rows, 1) f32, each entry is 0.0 or 1/keep_prob.
    # Pure HBM-streaming broadcasted multiply; f32 math then cast back.
    o_ref[...] = (x_ref[...].astype(jnp.float32) * scale_ref[...]).astype(o_ref.dtype)


# Per-block x budget.  With default double-buffering (2 input + 2 output
# buffers) this is ~8 MiB scoped VMEM: safe under v5e's 16 MiB default scoped
# limit and v6e/v7x's 32 MiB default (64 MiB physical on v7x).
_X_BLOCK_BUDGET = 2 * 1024 * 1024


def _pick_f_tile(f, b, itemsize):
    """Largest lane-dense (128-multiple) divisor of f that fits the budget,
    preferring a choice that leaves >= 4 pipelined tiles."""
    if f % 128 != 0:
        return None
    max_lanes = (_X_BLOCK_BUDGET // max(1, b * itemsize)) // 128 * 128
    max_lanes = max(128, min(2048, max_lanes))
    divisors = [t for t in range(128, min(f, max_lanes) + 1, 128) if f % t == 0]
    if not divisors:
        return None
    pipelined = [t for t in divisors if f // t >= 4]
    return max(pipelined) if pipelined else max(divisors)


def drop_path(x, drop_prob: float = 0.0, *, training: bool = False, seed: int = 0):
    """Pallas DropPath.  Identity when drop_prob == 0 or not training."""
    if drop_prob == 0.0 or not training:
        return x
    keep_prob = 1.0 - float(drop_prob)

    b = x.shape[0]
    f = int(np.prod(x.shape[1:])) if x.ndim > 1 else 1
    x2 = x.reshape(b, f)
    itemsize = jnp.dtype(x.dtype).itemsize
    x_bytes = b * f * itemsize

    # Per-sample scale, computed once (matches torch: floor(keep_prob + rand)).
    # TODO(synk): torch uses an implicit global RNG stream; here the caller must
    # vary `seed` per training step to get fresh masks.
    key = jax.random.PRNGKey(seed)
    u = jax.random.uniform(key, (b, 1), dtype=jnp.float32)
    scale = jnp.floor(jnp.float32(keep_prob) + u) * jnp.float32(1.0 / keep_prob)

    tf = _pick_f_tile(f, b, itemsize)

    if tf is not None and b * tf * itemsize <= 2 * _X_BLOCK_BUDGET:
        # Lane-dense tiling along the feature axis; tiles are independent.
        grid = (f // tf,)
        in_specs = [pl.BlockSpec((b, 1), lambda j: (0, 0)),
                    pl.BlockSpec((b, tf), lambda j: (0, j))]
        out_spec = pl.BlockSpec((b, tf), lambda j: (0, j))
    elif x_bytes <= _X_BLOCK_BUDGET:
        # Small tensor (possibly F not a multiple of 128): one full block.
        grid = (1,)
        in_specs = [pl.BlockSpec((b, 1), lambda j: (0, 0)),
                    pl.BlockSpec((b, f), lambda j: (0, 0))]
        out_spec = pl.BlockSpec((b, f), lambda j: (0, 0))
    else:
        # Large tensor whose feature axis is not lane-tileable: tile along B
        # in multiples of 8; the ragged last block is read-padded/write-masked.
        # TODO(synk): a single (8, F) row-block could still exceed VMEM for
        # extreme F that is not a multiple of 128; would need 2-D masked tiling.
        tb = max(8, (_X_BLOCK_BUDGET // max(1, f * itemsize)) // 8 * 8)
        tb = min(tb, ((b + 7) // 8) * 8)
        grid = (pl.cdiv(b, tb),)
        in_specs = [pl.BlockSpec((tb, 1), lambda i: (i, 0)),
                    pl.BlockSpec((tb, f), lambda i: (i, 0))]
        out_spec = pl.BlockSpec((tb, f), lambda i: (i, 0))

    out2 = pl.pallas_call(
        _drop_path_kernel,
        out_shape=jax.ShapeDtypeStruct((b, f), x.dtype),
        grid=grid,
        in_specs=in_specs,
        out_specs=out_spec,
        compiler_params=pltpu.CompilerParams(
            dimension_semantics=("parallel",)),
    )(scale, x2)
    return out2.reshape(x.shape)


class DropPath:
    """Mirror of the PyTorch module: drop_prob + training flag."""

    def __init__(self, drop_prob=None):
        self.drop_prob = 0.0 if drop_prob is None else float(drop_prob)
        self.training = True

    def __call__(self, x, *, seed: int = 0):
        return drop_path(x, self.drop_prob, training=self.training, seed=seed)


if __name__ == "__main__":
    key = jax.random.PRNGKey(0)
    # Typical residual-branch activation the module is applied to: (B, seq, hidden)
    B, S, H = 8, 16, 128
    x = jax.random.normal(key, (B, S, H), jnp.float32)

    drop_prob = 0.25
    keep_prob = 1.0 - drop_prob
    seed = 1234

    layer = DropPath(drop_prob)
    layer.training = True
    out = jax.block_until_ready(layer(x, seed=seed))
    assert out.shape == x.shape and out.dtype == x.dtype

    # Exact reference: recompute the same per-sample scale the wrapper uses.
    u = jax.random.uniform(jax.random.PRNGKey(seed), (B, 1), dtype=jnp.float32)
    scale_ref = jnp.floor(jnp.float32(keep_prob) + u) / jnp.float32(keep_prob)
    expected = np.asarray(x.reshape(B, -1)) * np.asarray(scale_ref)
    np.testing.assert_allclose(np.asarray(out).reshape(B, -1), expected,
                               rtol=1e-6, atol=1e-6)

    # Mask-agnostic semantic check: each sample is all-zero or exactly x/keep_prob.
    x2 = np.asarray(x).reshape(B, -1)
    o2 = np.asarray(out).reshape(B, -1)
    n_kept = 0
    for i in range(B):
        if np.all(o2[i] == 0.0):
            continue
        n_kept += 1
        np.testing.assert_allclose(o2[i], x2[i] / keep_prob, rtol=1e-6, atol=1e-6)
    assert n_kept >= 1, "degenerate mask: every sample dropped"

    # Non-128-multiple feature size (small single-block path).
    x_odd = jax.random.normal(jax.random.PRNGKey(1), (4, 7, 5), jnp.float32)
    out_odd = jax.block_until_ready(drop_path(x_odd, drop_prob, training=True, seed=7))
    xo = np.asarray(x_odd).reshape(4, -1)
    oo = np.asarray(out_odd).reshape(4, -1)
    for i in range(4):
        if np.all(oo[i] == 0.0):
            continue
        np.testing.assert_allclose(oo[i], xo[i] / keep_prob, rtol=1e-6, atol=1e-6)

    # Eval mode / zero drop prob are exact identities (no kernel launched).
    layer.training = False
    np.testing.assert_array_equal(np.asarray(layer(x)), np.asarray(x))
    layer.training = True
    layer.drop_prob = 0.0
    np.testing.assert_array_equal(np.asarray(layer(x)), np.asarray(x))

    print("KERNEL_OK")
</pallas_src>

<mosaic_0001>
module attributes {stable_mosaic.version = 11 : i64} {
  func.func @_drop_path_kernel(%arg0: i32, %arg1: memref<8x1xf32, #tpu.memory_space<vmem>>, %arg2: memref<8x512xf32, #tpu.memory_space<vmem>>, %arg3: memref<8x512xf32, #tpu.memory_space<vmem>>) attributes {dimension_semantics = [#tpu.dimension_semantics<parallel>], iteration_bounds = array<i64: 4>, scalar_prefetch = 0 : i64, scratch_operands = 0 : i64, tpu.core_type = #tpu.core_type<tc>, window_params = [{pipeline_mode = #tpu.pipeline_mode<synchronous>, transform_indices = @transform_0, window_bounds = array<i64: 8, 1>}, {transform_indices = @transform_1, window_bounds = array<i64: 8, 512>}, {transform_indices = @transform_2, window_bounds = array<i64: 8, 512>}]} {
    %c0 = arith.constant 0 : index
    %c0_0 = arith.constant 0 : index
    %0 = vector.load %arg2[%c0, %c0_0] : memref<8x512xf32, #tpu.memory_space<vmem>>, vector<8x512xf32>
    %c0_1 = arith.constant 0 : index
    %c0_2 = arith.constant 0 : index
    %1 = vector.load %arg1[%c0_1, %c0_2] : memref<8x1xf32, #tpu.memory_space<vmem>>, vector<8x1xf32>
    %2 = vector.broadcast %1 : vector<8x1xf32> to vector<8x512xf32>
    %3 = arith.mulf %0, %2 : vector<8x512xf32>
    %c0_3 = arith.constant 0 : index
    %c0_4 = arith.constant 0 : index
    %4 = vector.load %arg3[%c0_3, %c0_4] : memref<8x512xf32, #tpu.memory_space<vmem>>, vector<8x512xf32>
    tpu.vector_store %arg3[%c0_3, %c0_4], %3 {strides = array<i32>} : memref<8x512xf32, #tpu.memory_space<vmem>>, vector<8x512xf32>,
    return
  }
  func.func @transform_0(%arg0: i32) -> (i32, i32) {
    %c0_i32 = arith.constant 0 : i32
    %c0_i32_0 = arith.constant 0 : i32
    %c0_i32_1 = arith.constant 0 : i32
    return %c0_i32, %c0_i32_0 : i32, i32
  }
  func.func @transform_1(%arg0: i32) -> (i32, i32) {
    %c0_i32 = arith.constant 0 : i32
    %c0_i32_0 = arith.constant 0 : i32
    return %c0_i32, %arg0 : i32, i32
  }
  func.func @transform_2(%arg0: i32) -> (i32, i32) {
    %c0_i32 = arith.constant 0 : i32
    %c0_i32_0 = arith.constant 0 : i32
    return %c0_i32, %arg0 : i32, i32
  }
}

</mosaic_0001>

<bundles_post_ra>
// kernel: tpu_custom_call.1
= control target key start
LH: loop header
LB: loop body
LE: loop exit
PB: predicated region body
PF: predicated region fallthrough
CT: control target
= control target key end

     0   :  { %7 = vsyncpa [#allocation3], 0  ;;  %s607_s0 = inlined_call_operand.vmem [shape: f32[8,1], index: 0, kind: input, shape index: {}]   ;;  %s608_s1 = inlined_call_operand.hbm [shape: f32[8,2048], index: 1, kind: input, shape index: {}]   ;;  %s609_s2 = inlined_call_operand.hbm [shape: f32[8,2048], index: 2, kind: output, shape index: {}]  }
   0x1   :  { %9 = vsyncpa [#allocation3 + $0x1], 0 }
   0x2   :  { %10 = vsyncpa [#allocation4], 0 }
   0x3   :  { %12 = vsyncpa [#allocation4 + $0x1], 0  ;;  %s445_s9 = smov 0   ;;  %s447_s10 = smov 0  }
   0x4   :  { %s449_s11 = smov 0   ;;  %s451_s12 = smov 0  }
   0x5 LB: > { %s466_s13 = sadd.s32 4294967295, %s425_s12   ;;  %s265_s14 = sadd.s32 4294967294, %s425_s12   ;;  %s425_s12 = sphi %s451_s12, %s623_s12   ;;  %s421_s11 = sphi %s449_s11, %s622_s11   ;;  %s417_s10 = sphi %s447_s10, %s621_s10   ;;  %s413_s9 = sphi %s445_s9, %s620_s9  }
   0x6   : > { %s470_s15 = sadd.s32 1, %s425_s12   ;;  %s46_s16 = sadd.s32 1, %s421_s11 }
   0x7   : > { %s43_s17 = ssub.s32 %s425_s12, %s470_s15  ;;  %p53_p0 = scmp.ne.s32.totalorder %s421_s11, %s417_s10 }
   0x8   : > { %p44_p1 = scmp.eq.s32.totalorder %s43_s17, 0  ;;  %p54_p2 = scmp.eq.s32.totalorder %s425_s12, 0 }
   0x9   : > { %p59_p3 = scmp.ne.s32.totalorder %s417_s10, %s413_s9  ;;  %p60_p4 = scmp.eq.s32.totalorder %s466_s13, 0 }
   0xa   : > { %s482_s18 = scalar_select %p44_p1, %s421_s11, %s46_s16  }
   0xb   : > { %p484_p5 = por %p54_p2, %p53_p0  ;;  %p488_p6 = por %p60_p4, %p59_p3 }
   0xc   : > { %p83_p7 = scmp.eq.s32.totalorder %s466_s13, 3  ;;  %p89_p8 = scmp.eq.s32.totalorder %s265_s14, 3 }
   0xd   : > { %p293_p9 = scmp.lt.s32.totalorder %s425_s12, 4  ;;  %s112_s23 = sand.u32 1, %s421_s11  }
   0xe   : > { %p494_p10 = por %p83_p7, %p53_p0  ;;  %p498_p11 = por %p89_p8, %p59_p3 }
   0xf   : > { %s279_s24 = sshll.u32 %s425_s12, 9  ;;  %s268_s25 = sshll.u32 %s112_s23, 5 }
  0x10   : > { %s613_s21 = scalar_select %p494_p10, 1, 0 }
  0x11   : > { %s614_s22 = scalar_select %p498_p11, 1, 0 }
  0x12   : > { %s507_s28 = scalar_lea.hbm %s608_s1, %s279_s24  ;;  %s116_s29 = scalar_lea.vmem [#allocation2], %s268_s25 }
  0x13   : > { %s124_s30 = sshll.u32 %s116_s29, 4  ;;  %p511_p12 = pnand %p293_p9, %p484_p5  ;;  %s515_s30 = int_to_ptr.vmem [resolvable:$true] %s124_s30 }
  0x14   : > { %s113_s4 = scalar_lea.sflag [#allocation3], %s112_s23  ;;  %s329_s5 = scalar_lea.hbm %s507_s28, 512 }
  0x15   : > { %p330_p1 = scmp.ne.s32.totalorder %s507_s28, %s329_s5  ;;  %p331_p2 = pneg %p511_p12 }
  0x16   : > { %s334_s8 = scalar_lea.hbm %s608_s1, 2048  ;;  %p335_p5 = scmp.lt.u32.totalorder %s507_s28, %s608_s1 }
  0x17   : > { %p332_p3 = pnand %p331_p2, %p330_p1  ;;  %p336_p7 = scmp.lt.u32.totalorder %s334_s8, %s329_s5 }
  0x18   : > { %p338_p9 = scmp.lt.u32.totalorder %s329_s5, %s507_s28 }
  0x19   : > { %p333_p4 = pneg %p332_p3  ;;  %p337_p8 = por %p336_p7, %p335_p5 }
  0x1b   : > { %p339_p13 = por %p338_p9, %p337_p8 }
  0x1d   : > { %p340_p0 = pnand %p339_p13, %p333_p4 }
  0x1f   : > { %343 = shalt.err (!%p340_p0)
}
  0x20   : > { %s344_s17 = scalar_lea.vmem %s515_s30, 512  ;;  %s427_s19 = smov [#allocation2]  }
  0x21   : > { %p345_p1 = scmp.ne.s32.totalorder %s515_s30, %s344_s17  ;;  %s349_s23 = sshll.u32 %s427_s19, 4  ;;  %s350_s23 = int_to_ptr.vmem [resolvable:$false] %s349_s23 }
  0x22   : > { %s351_s24 = scalar_lea.vmem %s350_s23, 1024  ;;  %p352_p10 = scmp.lt.s32.totalorder %s515_s30, %s350_s23 }
  0x23   : > { %p347_p3 = pnand %p345_p1, %p331_p2  ;;  %p353_p5 = scmp.lt.s32.totalorder %s351_s24, %s344_s17 }
  0x25   : > { %p348_p11 = pneg %p347_p3  ;;  %p354_p7 = por %p353_p5, %p352_p10 }
  0x27   : > { %p355_p8 = pnand %p354_p7, %p348_p11 }
  0x29   : > { %358 = shalt.err (!%p355_p8)
}
  0x2a   : > { %288 = dma.hbm_to_vmem [thread:$0]  (!%p511_p12), %s507_s28, 512, %s515_s30, %s113_s4  }
  0x2b   : > { %p616_p13 = scmp.lt.s32.totalorder %s425_s12, 5  ;;  %p617_p0 = scmp.ge.s32.totalorder %s425_s12, 1 }
  0x2d   : > { %p130_p2 = pnand %p617_p0, %p616_p13 }
  0x2e   : > { %s549_s25 = sand.u32 (!%p130_p2), 1, %s417_s10  }
  0x2f   : > { %133 = sbr.rel (%p130_p2) target bundleno = 202 (0xca), region = 28  ;;  %s272_s26 = sshll.u32 (!%p130_p2), %s549_s25, 5 }
  0x30   : > { %s136_s27 = scalar_lea.sflag (!%p130_p2), [#allocation3], %s549_s25  ;;  %s139_s29 = scalar_lea.vmem (!%p130_p2), [#allocation2], %s272_s26 }
  0x36   : > { %404 = dma.done.wait (%p488_p6), %s136_s27, 512  }
  0x37   : > { %406 = vsyncadd (%p488_p6), %s136_s27, 4294966784  ;;  %v428_v0 = vmov 0   ;;  %v166_v1 = vld [vmem:[%s607_s0] sm:$0xff]  ;;  %v163_v3 = vld [vmem:[%s139_s29 + $0x8] sm:$0xff]  ;;  %s280_s3 = sshll.u32 %s466_s13, 9  ;;  %s159_s4 = scalar_lea.vmem [#allocation5], %s272_s26 }
  0x38   : > { %328 = vset.pattern.permute.xlu0 %v428_v0  ;;  %v162_v2 = vld [vmem:[%s139_s29] sm:$0xff]  ;;  %v164_v4 = vld [vmem:[%s139_s29 + $0x10] sm:$0xff]  ;;  %v165_v5 = vld [vmem:[%s139_s29 + $0x18] sm:$0xff]  ;;  %s195_s5 = sshll.u32 %s159_s4, 4  ;;  %s564_s7 = scalar_lea.hbm %s609_s2, %s280_s3  ;;  %s566_s5 = int_to_ptr.vmem [resolvable:$true] %s195_s5 }
  0x39   : > { %169 = vperm.xlu0 %328, %v166_v1   ;;  %s181_s13 = scalar_lea.sflag [#allocation4], %s549_s25  ;;  %s359_s8 = scalar_lea.vmem %s566_s5, 512 }
  0x3a   : > { %p360_p6 = scmp.ne.s32.totalorder %s566_s5, %s359_s8  ;;  %p618_p10 = scmp.ne.s32.totalorder %s613_s21, 0 }
  0x3b   : > { %s429_s14 = smov [#allocation5]  }
  0x3c   : > { %p361_p11 = pnand %p360_p6, %p618_p10  ;;  %s363_s16 = sshll.u32 %s429_s14, 4  ;;  %s364_s16 = int_to_ptr.vmem [resolvable:$false] %s363_s16 }
  0x3d   : > { %s365_s17 = scalar_lea.vmem %s364_s16, 1024  ;;  %p366_p4 = scmp.lt.s32.totalorder %s566_s5, %s364_s16 }
  0x3e   : > { %p362_p12 = pneg %p361_p11  ;;  %p367_p9 = scmp.lt.s32.totalorder %s365_s17, %s359_s8 }
  0x40   : > { %p368_p1 = por %p367_p9, %p366_p4 }
  0x42   : > { %p369_p3 = pnand %p368_p1, %p362_p12 }
  0xb8   : > { %v170_v6 = vpop.permute.xlu0 %169 }
  0xb9   : > { %v172_v7 = vmul.f32 %v170_v6, %v162_v2  ;;  %v173_v8 = vmul.f32 %v170_v6, %v163_v3  ;;  %v174_v9 = vmul.f32 %v170_v6, %v164_v4  ;;  %v175_v10 = vmul.f32 %v170_v6, %v165_v5 }
  0xbb   : > { %176 = vst [vmem:[%s159_s4] sm:$0xff] %v172_v7  ;;  %177 = vst [vmem:[%s159_s4 + $0x8] sm:$0xff] %v173_v8 }
  0xbc   : > { %178 = vst [vmem:[%s159_s4 + $0x10] sm:$0xff] %v174_v9  ;;  %179 = vst [vmem:[%s159_s4 + $0x18] sm:$0xff] %v175_v10 }
  0xbd   : > { %372 = shalt.err (!%p369_p3)
}
  0xbe   : > { %s373_s19 = scalar_lea.hbm %s564_s7, 512  ;;  %s377_s25 = scalar_lea.hbm %s609_s2, 2048 }
  0xbf   : > { %p374_p5 = scmp.ne.s32.totalorder %s564_s7, %s373_s19  ;;  %p378_p13 = scmp.lt.u32.totalorder %s564_s7, %s609_s2 }
  0xc0   : > { %p379_p0 = scmp.lt.u32.totalorder %s377_s25, %s373_s19  ;;  %p381_p6 = scmp.lt.u32.totalorder %s373_s19, %s564_s7 }
  0xc1   : > { %p375_p7 = pnand %p374_p5, %p618_p10 }
  0xc2   : > { %p380_p2 = por %p379_p0, %p378_p13 }
  0xc3   : > { %p376_p8 = pneg %p375_p7 }
  0xc4   : > { %p382_p11 = por %p381_p6, %p380_p2 }
  0xc6   : > { %p383_p12 = pnand %p382_p11, %p376_p8 }
  0xc8   : > { %386 = shalt.err (!%p383_p12)
}
  0xc9   : > { %283 = dma.vmem_to_hbm [thread:$0]  (%p618_p10), %s566_s5, 512, %s564_s7, %s181_s13  }
  0xca PF: > { %p294_p4 = scmp.ge.s32.totalorder %s425_s12, 2  ;;  %s207_s29 = sand.u32 1, %s413_s9  }
  0xcb   : > { %p619_p9 = scmp.ne.s32.totalorder %s614_s22, 0  ;;  %s208_s28 = scalar_lea.sflag [#allocation4], %s207_s29 }
  0xcd   : > { %p290_p1 = pnand %p294_p4, %p619_p9 }
  0xcf   : > { %408 = dma.done.wait (!%p290_p1), %s208_s28, 512  }
  0xd0   : > { %410 = vsyncadd (!%p290_p1), %s208_s28, 4294966784  ;;  %p15_p3 = scmp.ge.s32.totalorder %s470_s15, 6   ;;  %s620_s9 = smov %s417_s10 }
  0xd1   : > { %s621_s10 = smov %s421_s11  ;;  %s622_s11 = smov %s482_s18 }
  0xd2   : > { %s623_s12 = smov %s470_s15  ;;  %17 = sbr.rel (!%p15_p3) target bundleno = 5 (0x5), region = 73 }
  0xd9   :  { %213 = vsyncpa [#allocation3], 1 }
  0xda   :  { %215 = vsyncpa [#allocation3 + $0x1], 1 }
  0xdb   :  { %216 = vsyncpa [#allocation4], 1 }
  0xdc   :  { %218 = vsyncpa [#allocation4 + $0x1], 1 }

</bundles_post_ra>
